<compile_context>
chip_gen: v7x
topology: tpu7x:2x2x1
jax: 0.10.0
libtpu: 0.0.40
codegen_flags: <defaults>
</compile_context>

<pallas_src>
import jax
import jax.numpy as jnp
from jax.experimental import pallas as pl
from jax.experimental.pallas import tpu as pltpu

_MAX_LANE = 4096              # widest lane-dense last dim we consider (multiple of 128)
_TARGET_BLOCK_BYTES = 4 << 20  # ~4 MiB per array per pipeline step
_VMEM_LIMIT_BYTES = 56 << 20   # 6 arrays x 2 buffers x 4 MiB = 48 MiB + headroom (< v7x 64 MiB)


def _elementwise_kernel(x_ref, add_ref, sub_ref, mul_ref, div_ref, sq_ref):
    x = x_ref[...]
    add_ref[...] = x + 2.0
    sub_ref[...] = x - 2.0
    mul_ref[...] = x * 2.0
    div_ref[...] = x * 0.5     # exact division by 2 for floats
    sq_ref[...] = x * x


def _jnp_reference(x):
    return {
        "addition": x + 2.0,
        "subtraction": x - 2.0,
        "multiplication": x * 2.0,
        "division": x / 2.0,
        "squared": x * x,
    }


def _pick_lane_width(total):
    """Largest multiple of 128 (<= _MAX_LANE) that divides `total`, or 0 if none."""
    if total % 128 != 0:
        return 0
    cap = min(_MAX_LANE, total)
    lane = cap - (cap % 128)
    while lane >= 128:
        if total % lane == 0:
            return lane
        lane -= 128
    return 0


def _pick_block_rows(rows, lane, itemsize):
    """Multiple-of-8 block_rows, <= ~4 MiB/array, <= ~rows/2 (>=2 grid steps for v7x)."""
    if rows <= 8:
        return rows  # single full-extent block (block == full dims is always legal)
    max_rows = max(8, (_TARGET_BLOCK_BYTES // (lane * itemsize)) // 8 * 8)
    half = max(8, ((rows // 2) // 8) * 8)
    cap = max(8, min(max_rows, half))
    # Prefer a multiple-of-8 divisor of rows -> no masked tail block.
    for br in range(cap, 7, -8):
        if rows % br == 0:
            return br
    return cap  # tail block is masked; safe here because the op is purely elementwise


def pt_module_forward(x, *, min_pallas_elements=1 << 14):
    """Forward pass matching PtModule.forward (the nested pow loop == elementwise square)."""
    total = x.size
    lane = _pick_lane_width(total)
    if total < min_pallas_elements or lane == 0:
        # Tiny or 128-indivisible inputs: launch/DMA overhead dominates; let XLA fuse.
        return _jnp_reference(x)

    rows = total // lane
    itemsize = jnp.dtype(x.dtype).itemsize
    block_rows = _pick_block_rows(rows, lane, itemsize)

    x2d = x.reshape(rows, lane)  # exact reshape: no padding, no extra HBM traffic
    grid = (pl.cdiv(rows, block_rows),)
    spec = pl.BlockSpec((block_rows, lane), lambda i: (i, 0))
    out_sds = jax.ShapeDtypeStruct((rows, lane), x.dtype)

    outs = pl.pallas_call(
        _elementwise_kernel,
        out_shape=(out_sds,) * 5,
        grid=grid,
        in_specs=[spec],
        out_specs=(spec,) * 5,
        compiler_params=pltpu.CompilerParams(
            dimension_semantics=("parallel",),
            vmem_limit_bytes=_VMEM_LIMIT_BYTES,
        ),
        cost_estimate=pl.CostEstimate(
            flops=5 * total,
            bytes_accessed=6 * total * itemsize,  # 1 input stream + 5 output streams
            transcendentals=0,
        ),
    )(x2d)

    names = ("addition", "subtraction", "multiplication", "division", "squared")
    # No padding was applied, so these reshapes are pure views (no copy traffic).
    return {name: y.reshape(x.shape) for name, y in zip(names, outs)}


if __name__ == "__main__":
    key = jax.random.PRNGKey(0)
    k1, k2 = jax.random.split(key)

    # Small NCHW shape consistent with the module; force the Pallas path so the
    # kernel is exercised (single full-extent block case: lane=2048, rows=1).
    x_small = jax.random.normal(k1, (2, 4, 16, 16), dtype=jnp.float32)
    out_small = pt_module_forward(x_small, min_pallas_elements=0)
    jax.block_until_ready(out_small)

    # Second shape exercising the multi-step grid with zero padding
    # (total=655360 -> lane=4096, rows=160, block_rows=80, grid=(2,)).
    x_big = jax.random.normal(k2, (4, 8, 128, 160), dtype=jnp.float32)
    out_big = pt_module_forward(x_big, min_pallas_elements=0)
    jax.block_until_ready(out_big)

    for x, outs in ((x_small, out_small), (x_big, out_big)):
        ref = _jnp_reference(x)
        for name in ref:
            assert outs[name].shape == x.shape, name
            assert jnp.allclose(outs[name], ref[name], atol=1e-6), name

    print("KERNEL_OK")
</pallas_src>

<mosaic_0001>
module attributes {stable_mosaic.version = 11 : i64} {
  func.func @_elementwise_kernel(%arg0: i32, %arg1: memref<1x2048xf32, #tpu.memory_space<vmem>>, %arg2: memref<1x2048xf32, #tpu.memory_space<vmem>>, %arg3: memref<1x2048xf32, #tpu.memory_space<vmem>>, %arg4: memref<1x2048xf32, #tpu.memory_space<vmem>>, %arg5: memref<1x2048xf32, #tpu.memory_space<vmem>>, %arg6: memref<1x2048xf32, #tpu.memory_space<vmem>>) attributes {dimension_semantics = [#tpu.dimension_semantics<parallel>], iteration_bounds = array<i64: 1>, scalar_prefetch = 0 : i64, scratch_operands = 0 : i64, tpu.core_type = #tpu.core_type<tc>, window_params = [{transform_indices = @transform_0, window_bounds = array<i64: 1, 2048>}, {transform_indices = @transform_1, window_bounds = array<i64: 1, 2048>}, {transform_indices = @transform_2, window_bounds = array<i64: 1, 2048>}, {transform_indices = @transform_3, window_bounds = array<i64: 1, 2048>}, {transform_indices = @transform_4, window_bounds = array<i64: 1, 2048>}, {transform_indices = @transform_5, window_bounds = array<i64: 1, 2048>}]} {
    %c0 = arith.constant 0 : index
    %c0_0 = arith.constant 0 : index
    %0 = vector.load %arg1[%c0, %c0_0] : memref<1x2048xf32, #tpu.memory_space<vmem>>, vector<1x2048xf32>
    %cst = arith.constant 2.000000e+00 : f32
    %1 = vector.broadcast %cst : f32 to vector<1x2048xf32>
    %2 = arith.addf %0, %1 : vector<1x2048xf32>
    %c0_1 = arith.constant 0 : index
    %c0_2 = arith.constant 0 : index
    %3 = vector.load %arg2[%c0_1, %c0_2] : memref<1x2048xf32, #tpu.memory_space<vmem>>, vector<1x2048xf32>
    tpu.vector_store %arg2[%c0_1, %c0_2], %2 {strides = array<i32>} : memref<1x2048xf32, #tpu.memory_space<vmem>>, vector<1x2048xf32>,
    %cst_3 = arith.constant 2.000000e+00 : f32
    %4 = vector.broadcast %cst_3 : f32 to vector<1x2048xf32>
    %5 = arith.subf %0, %4 : vector<1x2048xf32>
    %c0_4 = arith.constant 0 : index
    %c0_5 = arith.constant 0 : index
    %6 = vector.load %arg3[%c0_4, %c0_5] : memref<1x2048xf32, #tpu.memory_space<vmem>>, vector<1x2048xf32>
    tpu.vector_store %arg3[%c0_4, %c0_5], %5 {strides = array<i32>} : memref<1x2048xf32, #tpu.memory_space<vmem>>, vector<1x2048xf32>,
    %cst_6 = arith.constant 2.000000e+00 : f32
    %7 = vector.broadcast %cst_6 : f32 to vector<1x2048xf32>
    %8 = arith.mulf %0, %7 : vector<1x2048xf32>
    %c0_7 = arith.constant 0 : index
    %c0_8 = arith.constant 0 : index
    %9 = vector.load %arg4[%c0_7, %c0_8] : memref<1x2048xf32, #tpu.memory_space<vmem>>, vector<1x2048xf32>
    tpu.vector_store %arg4[%c0_7, %c0_8], %8 {strides = array<i32>} : memref<1x2048xf32, #tpu.memory_space<vmem>>, vector<1x2048xf32>,
    %cst_9 = arith.constant 5.000000e-01 : f32
    %10 = vector.broadcast %cst_9 : f32 to vector<1x2048xf32>
    %11 = arith.mulf %0, %10 : vector<1x2048xf32>
    %c0_10 = arith.constant 0 : index
    %c0_11 = arith.constant 0 : index
    %12 = vector.load %arg5[%c0_10, %c0_11] : memref<1x2048xf32, #tpu.memory_space<vmem>>, vector<1x2048xf32>
    tpu.vector_store %arg5[%c0_10, %c0_11], %11 {strides = array<i32>} : memref<1x2048xf32, #tpu.memory_space<vmem>>, vector<1x2048xf32>,
    %13 = arith.mulf %0, %0 : vector<1x2048xf32>
    %c0_12 = arith.constant 0 : index
    %c0_13 = arith.constant 0 : index
    %14 = vector.load %arg6[%c0_12, %c0_13] : memref<1x2048xf32, #tpu.memory_space<vmem>>, vector<1x2048xf32>
    tpu.vector_store %arg6[%c0_12, %c0_13], %13 {strides = array<i32>} : memref<1x2048xf32, #tpu.memory_space<vmem>>, vector<1x2048xf32>,
    return
  }
  func.func @transform_0(%arg0: i32) -> (i32, i32) {
    %c0_i32 = arith.constant 0 : i32
    %c0_i32_0 = arith.constant 0 : i32
    return %arg0, %c0_i32 : i32, i32
  }
  func.func @transform_1(%arg0: i32) -> (i32, i32) {
    %c0_i32 = arith.constant 0 : i32
    %c0_i32_0 = arith.constant 0 : i32
    return %arg0, %c0_i32 : i32, i32
  }
  func.func @transform_2(%arg0: i32) -> (i32, i32) {
    %c0_i32 = arith.constant 0 : i32
    %c0_i32_0 = arith.constant 0 : i32
    return %arg0, %c0_i32 : i32, i32
  }
  func.func @transform_3(%arg0: i32) -> (i32, i32) {
    %c0_i32 = arith.constant 0 : i32
    %c0_i32_0 = arith.constant 0 : i32
    return %arg0, %c0_i32 : i32, i32
  }
  func.func @transform_4(%arg0: i32) -> (i32, i32) {
    %c0_i32 = arith.constant 0 : i32
    %c0_i32_0 = arith.constant 0 : i32
    return %arg0, %c0_i32 : i32, i32
  }
  func.func @transform_5(%arg0: i32) -> (i32, i32) {
    %c0_i32 = arith.constant 0 : i32
    %c0_i32_0 = arith.constant 0 : i32
    return %arg0, %c0_i32 : i32, i32
  }
}

</mosaic_0001>

<bundles_post_ra>
// kernel: tpu_custom_call.1
= control target key start
LH: loop header
LB: loop body
LE: loop exit
PB: predicated region body
PF: predicated region fallthrough
CT: control target
= control target key end

     0   :  { %11 = vsyncpa [#allocation3], 0  ;;  %s410_s0 = inlined_call_operand.hbm [shape: f32[1,2048], index: 0, kind: input, shape index: {}]   ;;  %s411_s1 = inlined_call_operand.hbm [shape: f32[1,2048], index: 1, kind: output, shape index: {0}]   ;;  %s412_s2 = inlined_call_operand.hbm [shape: f32[1,2048], index: 2, kind: output, shape index: {1}]   ;;  %s413_s3 = inlined_call_operand.hbm [shape: f32[1,2048], index: 3, kind: output, shape index: {2}]   ;;  %s414_s4 = inlined_call_operand.hbm [shape: f32[1,2048], index: 4, kind: output, shape index: {3}]   ;;  %s415_s5 = inlined_call_operand.hbm [shape: f32[1,2048], index: 5, kind: output, shape index: {4}]  }
   0x1   :  { %12 = vsyncpa [#allocation4], 0 }
   0x2   :  { %13 = vsyncpa [#allocation7], 0 }
   0x3   :  { %14 = vsyncpa [#allocation10], 0  ;;  %s267_s18 = smov [#allocation2]   ;;  %s127_s22 = scalar_lea.hbm %s410_s0, 256 }
   0x4   :  { %s21_s19 = sshll.u32 %s267_s18, 4  ;;  %p128_p0 = scmp.ne.s32.totalorder %s410_s0, %s127_s22  ;;  %s22_s19 = int_to_ptr.vmem [resolvable:$true] %s21_s19 }
   0x5   :  { %p131_p1 = scmp.lt.u32.totalorder %s127_s22, %s410_s0 }
   0x7   :  { %p133_p2 = pnand %p131_p1, %p128_p0 }
   0x9   :  { %136 = shalt.err (!%p133_p2)
}
   0xa   :  { %s137_s27 = scalar_lea.vmem %s22_s19, 256  ;;  %p142_p4 = scmp.lt.s32.totalorder %s22_s19, %s22_s19 }
   0xb   :  { %p138_p3 = scmp.ne.s32.totalorder %s22_s19, %s137_s27  ;;  %p143_p5 = scmp.lt.s32.totalorder %s137_s27, %s137_s27 }
   0xd   :  { %p144_p6 = por %p143_p5, %p142_p4 }
   0xf   :  { %p145_p7 = pnand %p144_p6, %p138_p3 }
  0x11   :  { %148 = shalt.err (!%p145_p7)
}
  0x12   :  { %24 = dma.hbm_to_vmem [thread:$0]  %s410_s0, 256, %s22_s19, [#allocation3]  }
  0x13   :  { %259 = dma.done.wait [#allocation3], 256  }
  0x14   :  { %260 = vsyncadd [#allocation3], 4294967040  ;;  %s268_s30 = smov [#allocation6]   ;;  %s269_s7 = smov [#allocation9]   ;;  %v28_v0 = vld [vmem:[#allocation2] sm:$0xff]  ;;  %v29_v1 = vld [vmem:[#allocation2 + $0x8] sm:$0xff] }
  0x15   :  { %s66_s6 = sshll.u32 %s268_s30, 4  ;;  %s86_s8 = sshll.u32 %s269_s7, 4  ;;  %v119_v2 = vadd.f32 -2.0, %v28_v0  ;;  %v120_v3 = vadd.f32 -2.0, %v29_v1  ;;  %v42_v4 = vmul.f32 0.5, %v28_v0  ;;  %v43_v5 = vmul.f32 0.5, %v29_v1  ;;  %s315_s6 = int_to_ptr.vmem [resolvable:$true] %s66_s6  ;;  %s317_s8 = int_to_ptr.vmem [resolvable:$true] %s86_s8 }
  0x16   :  { %s270_s9 = smov [#allocation5]   ;;  %s271_s11 = smov [#allocation8]   ;;  %v30_v6 = vadd.f32 2.0, %v28_v0  ;;  %v31_v7 = vadd.f32 2.0, %v29_v1  ;;  %v38_v8 = vmul.f32 2.0, %v28_v0  ;;  %v39_v9 = vmul.f32 2.0, %v29_v1 }
  0x17   :  { %s56_s10 = sshll.u32 %s270_s9, 4  ;;  %s76_s12 = sshll.u32 %s271_s11, 4  ;;  %36 = vst [vmem:[#allocation6] sm:$0xff] %v119_v2  ;;  %37 = vst [vmem:[#allocation6 + $0x8] sm:$0xff] %v120_v3  ;;  %v46_v10 = vmul.f32 %v28_v0, %v28_v0  ;;  %v47_v11 = vmul.f32 %v29_v1, %v29_v1  ;;  %s319_s10 = int_to_ptr.vmem [resolvable:$true] %s56_s10  ;;  %s321_s12 = int_to_ptr.vmem [resolvable:$true] %s76_s12 }
  0x18   :  { %s272_s13 = smov [#allocation11]   ;;  %44 = vst [vmem:[#allocation9] sm:$0xff] %v42_v4  ;;  %45 = vst [vmem:[#allocation9 + $0x8] sm:$0xff] %v43_v5  ;;  %s149_s0 = scalar_lea.vmem %s315_s6, 256 }
  0x19   :  { %s96_s14 = sshll.u32 %s272_s13, 4  ;;  %32 = vst [vmem:[#allocation5] sm:$0xff] %v30_v6  ;;  %33 = vst [vmem:[#allocation5 + $0x8] sm:$0xff] %v31_v7  ;;  %p150_p8 = scmp.ne.s32.totalorder %s315_s6, %s149_s0  ;;  %s323_s14 = int_to_ptr.vmem [resolvable:$true] %s96_s14 }
  0x1a   :  { %40 = vst [vmem:[#allocation8] sm:$0xff] %v38_v8  ;;  %41 = vst [vmem:[#allocation8 + $0x8] sm:$0xff] %v39_v9  ;;  %p154_p9 = scmp.lt.s32.totalorder %s315_s6, %s315_s6  ;;  %p155_p10 = scmp.lt.s32.totalorder %s149_s0, %s149_s0 }
  0x1c   :  { %p156_p11 = por %p155_p10, %p154_p9 }
  0x1e   :  { %p157_p12 = pnand %p156_p11, %p150_p8 }
  0x20   :  { %160 = shalt.err (!%p157_p12)
}
  0x21   :  { %s161_s17 = scalar_lea.hbm %s412_s2, 256 }
  0x22   :  { %p162_p13 = scmp.ne.s32.totalorder %s412_s2, %s161_s17  ;;  %p165_p0 = scmp.lt.u32.totalorder %s161_s17, %s412_s2 }
  0x24   :  { %p167_p1 = pnand %p165_p0, %p162_p13 }
  0x26   :  { %170 = shalt.err (!%p167_p1)
}
  0x27   :  { %69 = dma.vmem_to_hbm [thread:$0]  %s315_s6, 256, %s412_s2, [#allocation7]   ;;  %48 = vst [vmem:[#allocation11] sm:$0xff] %v46_v10  ;;  %49 = vst [vmem:[#allocation11 + $0x8] sm:$0xff] %v47_v11 }
  0x28   :  { %s171_s24 = scalar_lea.vmem %s317_s8, 256  ;;  %p176_p3 = scmp.lt.s32.totalorder %s317_s8, %s317_s8 }
  0x29   :  { %p172_p2 = scmp.ne.s32.totalorder %s317_s8, %s171_s24  ;;  %p177_p4 = scmp.lt.s32.totalorder %s171_s24, %s171_s24 }
  0x2b   :  { %p178_p5 = por %p177_p4, %p176_p3 }
  0x2d   :  { %p179_p6 = pnand %p178_p5, %p172_p2 }
  0x2f   :  { %182 = shalt.err (!%p179_p6)
}
  0x30   :  { %s183_s27 = scalar_lea.hbm %s414_s4, 256 }
  0x31   :  { %p184_p7 = scmp.ne.s32.totalorder %s414_s4, %s183_s27  ;;  %p187_p8 = scmp.lt.u32.totalorder %s183_s27, %s414_s4 }
  0x33   :  { %p189_p9 = pnand %p187_p8, %p184_p7 }
  0x35   :  { %192 = shalt.err (!%p189_p9)
}
  0x36   :  { %89 = dma.vmem_to_hbm [thread:$0]  %s317_s8, 256, %s414_s4, [#allocation10]  }
  0x37   :  { %s193_s9 = scalar_lea.vmem %s319_s10, 256  ;;  %p198_p11 = scmp.lt.s32.totalorder %s319_s10, %s319_s10 }
  0x38   :  { %p194_p10 = scmp.ne.s32.totalorder %s319_s10, %s193_s9  ;;  %p199_p12 = scmp.lt.s32.totalorder %s193_s9, %s193_s9 }
  0x3a   :  { %p200_p13 = por %p199_p12, %p198_p11 }
  0x3c   :  { %p201_p0 = pnand %p200_p13, %p194_p10 }
  0x3e   :  { %204 = shalt.err (!%p201_p0)
}
  0x3f   :  { %s205_s0 = scalar_lea.hbm %s411_s1, 256 }
  0x40   :  { %p206_p1 = scmp.ne.s32.totalorder %s411_s1, %s205_s0  ;;  %p209_p2 = scmp.lt.u32.totalorder %s205_s0, %s411_s1 }
  0x42   :  { %p211_p3 = pnand %p209_p2, %p206_p1 }
  0x44   :  { %214 = shalt.err (!%p211_p3)
}
  0x45   :  { %59 = dma.vmem_to_hbm [thread:$0]  %s319_s10, 256, %s411_s1, [#allocation4]  }
  0x46   :  { %s215_s19 = scalar_lea.vmem %s321_s12, 256  ;;  %p220_p5 = scmp.lt.s32.totalorder %s321_s12, %s321_s12 }
  0x47   :  { %p216_p4 = scmp.ne.s32.totalorder %s321_s12, %s215_s19  ;;  %p221_p6 = scmp.lt.s32.totalorder %s215_s19, %s215_s19 }
  0x49   :  { %p222_p7 = por %p221_p6, %p220_p5 }
  0x4b   :  { %p223_p8 = pnand %p222_p7, %p216_p4 }
  0x4d   :  { %226 = shalt.err (!%p223_p8)
}
  0x4e   :  { %s227_s22 = scalar_lea.hbm %s413_s3, 256 }
  0x4f   :  { %p228_p9 = scmp.ne.s32.totalorder %s413_s3, %s227_s22  ;;  %p231_p10 = scmp.lt.u32.totalorder %s227_s22, %s413_s3 }
  0x51   :  { %p233_p11 = pnand %p231_p10, %p228_p9 }
  0x53   :  { %236 = shalt.err (!%p233_p11)
}
  0x54   :  { %79 = dma.vmem_to_hbm [thread:$0]  %s321_s12, 256, %s413_s3, [#allocation7]  }
  0x55   :  { %s237_s27 = scalar_lea.vmem %s323_s14, 256  ;;  %p242_p13 = scmp.lt.s32.totalorder %s323_s14, %s323_s14 }
  0x56   :  { %p238_p12 = scmp.ne.s32.totalorder %s323_s14, %s237_s27  ;;  %p243_p0 = scmp.lt.s32.totalorder %s237_s27, %s237_s27 }
  0x58   :  { %p244_p1 = por %p243_p0, %p242_p13 }
  0x5a   :  { %p245_p2 = pnand %p244_p1, %p238_p12 }
  0x5c   :  { %248 = shalt.err (!%p245_p2)
}
  0x5d   :  { %s249_s30 = scalar_lea.hbm %s415_s5, 256 }
  0x5e   :  { %p250_p3 = scmp.ne.s32.totalorder %s415_s5, %s249_s30  ;;  %p253_p4 = scmp.lt.u32.totalorder %s249_s30, %s415_s5 }
  0x60   :  { %p255_p5 = pnand %p253_p4, %p250_p3 }
  0x62   :  { %258 = shalt.err (!%p255_p5)
}
  0x63   :  { %99 = dma.vmem_to_hbm [thread:$0]  %s323_s14, 256, %s415_s5, [#allocation10]  }
  0x64   :  { %261 = dma.done.wait [#allocation4], 256  }
  0x65   :  { %262 = vsyncadd [#allocation4], 4294967040 }
  0x66   :  { %263 = dma.done.wait [#allocation7], 512  }
  0x67   :  { %264 = vsyncadd [#allocation7], 4294966784 }
  0x68   :  { %265 = dma.done.wait [#allocation10], 512  }
  0x69   :  { %266 = vsyncadd [#allocation10], 4294966784 }
  0x6a   :  { %115 = vsyncpa [#allocation3], 1 }
  0x6b   :  { %116 = vsyncpa [#allocation4], 1 }
  0x6c   :  { %117 = vsyncpa [#allocation7], 1 }
  0x6d   :  { %118 = vsyncpa [#allocation10], 1 }

</bundles_post_ra>
